<compile_context>
chip_gen: v7x
topology: tpu7x:2x2x1
jax: 0.10.0
libtpu: 0.0.40
codegen_flags: <defaults>
</compile_context>

<pallas_src>
import functools

import jax
import jax.numpy as jnp
from jax.experimental import pallas as pl
from jax.experimental.pallas import tpu as pltpu

_LANE = 128      # lane width (last dim)
_SUBLANE = 8     # sublane width (second-to-last dim)


def _round_up(x, m):
    return (x + m - 1) // m * m


def _pad_cols(a, cols):
    return jnp.pad(a, ((0, 0), (0, cols - a.shape[1])))


def _mlp_q(x_ref, w1_ref, b1_ref, w2_ref, b2_ref, w3_ref, b3_ref):
    """Fused fc1->relu->fc2->relu->fc3 on one (tb, in_dim) batch tile.

    MXU matmuls accumulate in f32; bias-add + ReLU epilogues stay f32 on the
    VPU (required on v5e, which has no bf16 VPU); activations are cast back
    to the compute dtype before feeding the next matmul. Returns f32
    (tb, n_pad) Q-values (padded action columns are exactly 0 because the
    padded weight/bias columns are 0).
    """
    x = x_ref[...]

    # fc1 + ReLU  (K = native in_dim, e.g. 32 -- MXU handles small K fine)
    h1 = jnp.dot(x, w1_ref[...], preferred_element_type=jnp.float32)
    h1 = jnp.maximum(h1 + b1_ref[...], 0.0)

    # fc2 + ReLU
    h2 = jnp.dot(h1.astype(w2_ref.dtype), w2_ref[...],
                 preferred_element_type=jnp.float32)
    h2 = jnp.maximum(h2 + b2_ref[...], 0.0)

    # fc3 (no activation)
    q = jnp.dot(h2.astype(w3_ref.dtype), w3_ref[...],
                preferred_element_type=jnp.float32)
    return q + b3_ref[...]


def _dqn_q_kernel(x_ref, w1_ref, b1_ref, w2_ref, b2_ref, w3_ref, b3_ref,
                  out_ref):
    """Q-value epilogue: lane-dense (tb, n_pad) store."""
    q = _mlp_q(x_ref, w1_ref, b1_ref, w2_ref, b2_ref, w3_ref, b3_ref)
    out_ref[...] = q.astype(out_ref.dtype)


def _dqn_argmax_kernel(x_ref, w1_ref, b1_ref, w2_ref, b2_ref, w3_ref, b3_ref,
                       out_ref, *, n_actions):
    """Fused DDQN consumer epilogue: greedy action per row, (tb, 1) int32.

    Cuts HBM writeback ~n_pad x versus storing padded Q-values. Padded action
    columns are masked to -inf before the reduction; ties resolve to the
    lowest index (matching torch.argmax / jnp.argmax).
    """
    q = _mlp_q(x_ref, w1_ref, b1_ref, w2_ref, b2_ref, w3_ref, b3_ref)
    col = jax.lax.broadcasted_iota(jnp.int32, q.shape, 1)
    qm = jnp.where(col < n_actions, q, -jnp.inf)
    row_max = jnp.max(qm, axis=-1, keepdims=True)
    first_idx = jnp.min(jnp.where(qm == row_max, col, q.shape[-1]),
                        axis=-1, keepdims=True)
    out_ref[...] = first_idx.astype(jnp.int32)


def _pick_batch_tile(batch, batch_tile):
    """Sublane-legal batch tile; >=2 grid steps when possible (v7x megacore)."""
    if batch <= _SUBLANE:
        return batch                      # block dim == full array dim: legal
    tb = _round_up(min(batch_tile, batch), _SUBLANE)
    if pl.cdiv(batch, tb) < 2:
        # Single-step grid would leave one v7x TensorCore idle; split in two.
        tb = _round_up(pl.cdiv(batch, 2), _SUBLANE)
    return tb


def _launch(kernel, state, params, *, out_cols, out_dtype, batch_tile,
            compute_dtype):
    w1, b1 = params["w1"], params["b1"]
    w2, b2 = params["w2"], params["b2"]
    w3, b3 = params["w3"], params["b3"]

    batch, in_dim = state.shape
    hidden = w1.shape[1]
    n_actions = w3.shape[1]
    n_pad = _round_up(n_actions, _LANE)   # lane-dense Q columns

    tb = _pick_batch_tile(batch, batch_tile)
    grid = (pl.cdiv(batch, tb),)          # ragged last block handled by Pallas

    # Compute-dtype operands. Only fc3's weight/bias columns are padded (to
    # n_pad) so padded Q lanes are exactly 0; everything else stays at native
    # width. Biases stay f32: they are added to the f32 MXU accumulator.
    x = state.astype(compute_dtype)
    w1c = w1.astype(compute_dtype)
    w2c = w2.astype(compute_dtype)
    w3p = _pad_cols(w3, n_pad).astype(compute_dtype)
    b1c = b1.astype(jnp.float32)
    b2c = b2.astype(jnp.float32)
    b3p = _pad_cols(b3, n_pad).astype(jnp.float32)

    def row_spec(cols):      # walks the batch dimension
        return pl.BlockSpec((tb, cols), lambda i: (i, 0))

    def const_spec(shape):   # VMEM-resident across all grid steps
        return pl.BlockSpec(shape, lambda i: (0, 0))

    c_item = jnp.dtype(compute_dtype).itemsize
    flops = 2 * batch * (in_dim * hidden + hidden * hidden +
                         hidden * n_actions)
    bytes_accessed = (
        x.size * c_item
        + (w1c.size + w2c.size + w3p.size) * c_item
        + (b1c.size + b2c.size + b3p.size) * 4
        + batch * out_cols * jnp.dtype(out_dtype).itemsize)

    return pl.pallas_call(
        kernel,
        out_shape=jax.ShapeDtypeStruct((batch, out_cols), out_dtype),
        grid=grid,
        in_specs=[
            row_spec(in_dim),                                   # state
            const_spec((in_dim, hidden)), const_spec((1, hidden)),   # fc1
            const_spec((hidden, hidden)), const_spec((1, hidden)),   # fc2
            const_spec((hidden, n_pad)), const_spec((1, n_pad)),     # fc3
        ],
        out_specs=row_spec(out_cols),
        compiler_params=pltpu.CompilerParams(
            dimension_semantics=("parallel",),
            # Let XLA fuse the (bf16-path) cast of `state` into the call's
            # input DMA instead of materializing a second full-batch array.
            allow_input_fusion=[True] + [False] * 6,
        ),
        cost_estimate=pl.CostEstimate(
            flops=flops, transcendentals=0, bytes_accessed=bytes_accessed),
    )(x, w1c, b1c, w2c, b2c, w3p, b3p)


@functools.partial(jax.jit,
                   static_argnames=("batch_tile", "compute_dtype", "out_dtype"))
def dqn_forward(state, params, *, batch_tile=4096,
                compute_dtype=jnp.float32, out_dtype=jnp.float32):
    """Fused DQN forward. Returns (B, n_pad) Q-values (n_pad = n_actions
    rounded up to 128); only the first n_actions columns are meaningful --
    slice lazily at the consumer, or use `dqn_greedy_actions` which fuses the
    argmax and avoids the Q writeback entirely.

    compute_dtype=jnp.bfloat16 halves HBM traffic for the batch-dominated
    streams and is recommended on v5e/v6e/v7x (f32 accumulation is kept).
    out_dtype=jnp.bfloat16 additionally halves the Q-value writeback.
    """
    n_actions = params["w3"].shape[1]
    n_pad = _round_up(n_actions, _LANE)
    return _launch(_dqn_q_kernel, state, params,
                   out_cols=n_pad, out_dtype=out_dtype,
                   batch_tile=batch_tile, compute_dtype=compute_dtype)


def dqn_q_values(state, params, **kwargs):
    """Module-equivalent forward(): (B, n_actions) Q-values."""
    n_actions = params["w3"].shape[1]
    return dqn_forward(state, params, **kwargs)[:, :n_actions]


@functools.partial(jax.jit, static_argnames=("batch_tile", "compute_dtype"))
def dqn_greedy_actions(state, params, *, batch_tile=4096,
                       compute_dtype=jnp.float32):
    """Fused forward + argmax epilogue: (B,) int32 greedy actions."""
    n_actions = params["w3"].shape[1]
    kernel = functools.partial(_dqn_argmax_kernel, n_actions=n_actions)
    out = _launch(kernel, state, params,
                  out_cols=1, out_dtype=jnp.int32,
                  batch_tile=batch_tile, compute_dtype=compute_dtype)
    return out[:, 0]


def init_dqn_params(key, input_dim, n_actions, hidden=64):
    """nn.Linear-style U(-1/sqrt(fan_in), 1/sqrt(fan_in)) init.

    Weights are stored as (in_features, out_features) for the kernel layout.
    """
    def linear(k, fan_in, fan_out):
        kw, kb = jax.random.split(k)
        bound = 1.0 / jnp.sqrt(jnp.float32(fan_in))
        w = jax.random.uniform(kw, (fan_in, fan_out), jnp.float32,
                               minval=-bound, maxval=bound)
        b = jax.random.uniform(kb, (1, fan_out), jnp.float32,
                               minval=-bound, maxval=bound)
        return w, b

    k1, k2, k3 = jax.random.split(key, 3)
    w1, b1 = linear(k1, input_dim, hidden)
    w2, b2 = linear(k2, hidden, hidden)
    w3, b3 = linear(k3, hidden, n_actions)
    return {"w1": w1, "b1": b1, "w2": w2, "b2": b2, "w3": w3, "b3": b3}


def _reference_forward(state, p):
    """Plain-JAX reference (also the right choice for O(1)-row acting batches)."""
    h1 = jnp.maximum(state @ p["w1"] + p["b1"], 0.0)
    h2 = jnp.maximum(h1 @ p["w2"] + p["b2"], 0.0)
    return h2 @ p["w3"] + p["b3"]


if __name__ == "__main__":
    # Small shapes consistent with the module: input_dims=[32], n_actions=16.
    input_dim = 32
    n_actions = 16

    key = jax.random.PRNGKey(0)
    key_params, key_s1, key_s2 = jax.random.split(key, 3)
    params = init_dqn_params(key_params, input_dim, n_actions)

    # 1) Tiny acting batch (smaller than one sublane): single full-dim block.
    state_small = jax.random.normal(key_s1, (2, input_dim), jnp.float32)
    q_small = jax.block_until_ready(dqn_q_values(state_small, params))
    ref_small = _reference_forward(state_small, params)
    assert q_small.shape == (2, n_actions)
    assert jnp.allclose(q_small, ref_small, atol=1e-5, rtol=1e-5), \
        "f32 kernel mismatch vs reference (tiny batch)"

    # 2) Replay-style ragged batch: native-width K, cdiv grid with >=2 steps.
    state_big = jax.random.normal(key_s2, (300, input_dim), jnp.float32)
    q_big = jax.block_until_ready(dqn_q_values(state_big, params))
    ref_big = _reference_forward(state_big, params)
    assert q_big.shape == (300, n_actions)
    assert jnp.allclose(q_big, ref_big, atol=1e-5, rtol=1e-5), \
        "f32 kernel mismatch vs reference (ragged batch)"

    # Padded Q lanes are exactly zero (zero-padded fc3 columns).
    q_padded = jax.block_until_ready(dqn_forward(state_big, params))
    assert q_padded.shape[1] == 128
    assert jnp.all(q_padded[:, n_actions:] == 0.0)

    # 3) Fused greedy-action epilogue (argmax over the real action columns).
    acts = jax.block_until_ready(dqn_greedy_actions(state_big, params))
    assert acts.shape == (300,) and acts.dtype == jnp.int32
    rows = jnp.arange(300)
    assert jnp.allclose(ref_big[rows, acts], jnp.max(ref_big, axis=-1),
                        atol=1e-4), "fused argmax picked a non-maximal action"

    # 4) bf16 compute path (recommended on v5e/v6e/v7x) with f32 accumulation.
    q_bf16 = jax.block_until_ready(
        dqn_q_values(state_big, params, compute_dtype=jnp.bfloat16))
    assert jnp.max(jnp.abs(q_bf16 - ref_big)) < 5e-2, \
        "bf16 kernel diverged from f32 reference"

    # 5) User batch_tile that is not a multiple of 8 still lowers (rounded up).
    q_bt = jax.block_until_ready(dqn_q_values(state_big, params,
                                              batch_tile=100))
    assert jnp.allclose(q_bt, ref_big, atol=1e-5, rtol=1e-5), \
        "non-multiple-of-8 batch_tile mismatch"

    print("KERNEL_OK")
</pallas_src>

<mosaic_0001>
module attributes {stable_mosaic.version = 11 : i64} {
  func.func @_dqn_q_kernel(%arg0: i32, %arg1: memref<2x32xf32, #tpu.memory_space<vmem>>, %arg2: memref<32x64xf32, #tpu.memory_space<vmem>>, %arg3: memref<1x64xf32, #tpu.memory_space<vmem>>, %arg4: memref<64x64xf32, #tpu.memory_space<vmem>>, %arg5: memref<1x64xf32, #tpu.memory_space<vmem>>, %arg6: memref<64x128xf32, #tpu.memory_space<vmem>>, %arg7: memref<1x128xf32, #tpu.memory_space<vmem>>, %arg8: memref<2x128xf32, #tpu.memory_space<vmem>>) attributes {dimension_semantics = [#tpu.dimension_semantics<parallel>], iteration_bounds = array<i64: 1>, scalar_prefetch = 0 : i64, scratch_operands = 0 : i64, tpu.core_type = #tpu.core_type<tc>, window_params = [{transform_indices = @transform_0, window_bounds = array<i64: 2, 32>}, {pipeline_mode = #tpu.pipeline_mode<synchronous>, transform_indices = @transform_1, window_bounds = array<i64: 32, 64>}, {pipeline_mode = #tpu.pipeline_mode<synchronous>, transform_indices = @transform_2, window_bounds = array<i64: 1, 64>}, {pipeline_mode = #tpu.pipeline_mode<synchronous>, transform_indices = @transform_3, window_bounds = array<i64: 64, 64>}, {pipeline_mode = #tpu.pipeline_mode<synchronous>, transform_indices = @transform_4, window_bounds = array<i64: 1, 64>}, {pipeline_mode = #tpu.pipeline_mode<synchronous>, transform_indices = @transform_5, window_bounds = array<i64: 64, 128>}, {pipeline_mode = #tpu.pipeline_mode<synchronous>, transform_indices = @transform_6, window_bounds = array<i64: 1, 128>}, {transform_indices = @transform_7, window_bounds = array<i64: 2, 128>}]} {
    %c0 = arith.constant 0 : index
    %c0_0 = arith.constant 0 : index
    %0 = vector.load %arg1[%c0, %c0_0] : memref<2x32xf32, #tpu.memory_space<vmem>>, vector<2x32xf32>
    %c0_1 = arith.constant 0 : index
    %c0_2 = arith.constant 0 : index
    %1 = vector.load %arg2[%c0_1, %c0_2] : memref<32x64xf32, #tpu.memory_space<vmem>>, vector<32x64xf32>
    %cst = arith.constant dense<0.000000e+00> : vector<2x64xf32>
    %2 = tpu.matmul %0, %1, %cst {dimension_numbers = #tpu.dot_dimension_numbers<[1], [0], [0], [1], [0, 0, 1, 1], [], []>} : vector<2x32xf32>, vector<32x64xf32>, vector<2x64xf32> -> vector<2x64xf32>
    %c0_3 = arith.constant 0 : index
    %c0_4 = arith.constant 0 : index
    %3 = vector.load %arg3[%c0_3, %c0_4] : memref<1x64xf32, #tpu.memory_space<vmem>>, vector<1x64xf32>
    %4 = vector.broadcast %3 : vector<1x64xf32> to vector<2x64xf32>
    %5 = arith.addf %2, %4 : vector<2x64xf32>
    %cst_5 = arith.constant 0.000000e+00 : f32
    %6 = vector.broadcast %cst_5 : f32 to vector<2x64xf32>
    %7 = arith.maximumf %5, %6 : vector<2x64xf32>
    %c0_6 = arith.constant 0 : index
    %c0_7 = arith.constant 0 : index
    %8 = vector.load %arg4[%c0_6, %c0_7] : memref<64x64xf32, #tpu.memory_space<vmem>>, vector<64x64xf32>
    %cst_8 = arith.constant dense<0.000000e+00> : vector<2x64xf32>
    %9 = tpu.matmul %7, %8, %cst_8 {dimension_numbers = #tpu.dot_dimension_numbers<[1], [0], [0], [1], [0, 0, 1, 1], [], []>} : vector<2x64xf32>, vector<64x64xf32>, vector<2x64xf32> -> vector<2x64xf32>
    %c0_9 = arith.constant 0 : index
    %c0_10 = arith.constant 0 : index
    %10 = vector.load %arg5[%c0_9, %c0_10] : memref<1x64xf32, #tpu.memory_space<vmem>>, vector<1x64xf32>
    %11 = vector.broadcast %10 : vector<1x64xf32> to vector<2x64xf32>
    %12 = arith.addf %9, %11 : vector<2x64xf32>
    %cst_11 = arith.constant 0.000000e+00 : f32
    %13 = vector.broadcast %cst_11 : f32 to vector<2x64xf32>
    %14 = arith.maximumf %12, %13 : vector<2x64xf32>
    %c0_12 = arith.constant 0 : index
    %c0_13 = arith.constant 0 : index
    %15 = vector.load %arg6[%c0_12, %c0_13] : memref<64x128xf32, #tpu.memory_space<vmem>>, vector<64x128xf32>
    %cst_14 = arith.constant dense<0.000000e+00> : vector<2x128xf32>
    %16 = tpu.matmul %14, %15, %cst_14 {dimension_numbers = #tpu.dot_dimension_numbers<[1], [0], [0], [1], [0, 0, 1, 1], [], []>} : vector<2x64xf32>, vector<64x128xf32>, vector<2x128xf32> -> vector<2x128xf32>
    %c0_15 = arith.constant 0 : index
    %c0_16 = arith.constant 0 : index
    %17 = vector.load %arg7[%c0_15, %c0_16] : memref<1x128xf32, #tpu.memory_space<vmem>>, vector<1x128xf32>
    %18 = vector.broadcast %17 : vector<1x128xf32> to vector<2x128xf32>
    %19 = arith.addf %16, %18 : vector<2x128xf32>
    %c0_17 = arith.constant 0 : index
    %c0_18 = arith.constant 0 : index
    %20 = vector.load %arg8[%c0_17, %c0_18] : memref<2x128xf32, #tpu.memory_space<vmem>>, vector<2x128xf32>
    tpu.vector_store %arg8[%c0_17, %c0_18], %19 {strides = array<i32>} : memref<2x128xf32, #tpu.memory_space<vmem>>, vector<2x128xf32>,
    return
  }
  func.func @transform_0(%arg0: i32) -> (i32, i32) {
    %c0_i32 = arith.constant 0 : i32
    %c0_i32_0 = arith.constant 0 : i32
    return %arg0, %c0_i32 : i32, i32
  }
  func.func @transform_1(%arg0: i32) -> (i32, i32) {
    %c0_i32 = arith.constant 0 : i32
    %c0_i32_0 = arith.constant 0 : i32
    %c0_i32_1 = arith.constant 0 : i32
    return %c0_i32, %c0_i32_0 : i32, i32
  }
  func.func @transform_2(%arg0: i32) -> (i32, i32) {
    %c0_i32 = arith.constant 0 : i32
    %c0_i32_0 = arith.constant 0 : i32
    %c0_i32_1 = arith.constant 0 : i32
    return %c0_i32, %c0_i32_0 : i32, i32
  }
  func.func @transform_3(%arg0: i32) -> (i32, i32) {
    %c0_i32 = arith.constant 0 : i32
    %c0_i32_0 = arith.constant 0 : i32
    %c0_i32_1 = arith.constant 0 : i32
    return %c0_i32, %c0_i32_0 : i32, i32
  }
  func.func @transform_4(%arg0: i32) -> (i32, i32) {
    %c0_i32 = arith.constant 0 : i32
    %c0_i32_0 = arith.constant 0 : i32
    %c0_i32_1 = arith.constant 0 : i32
    return %c0_i32, %c0_i32_0 : i32, i32
  }
  func.func @transform_5(%arg0: i32) -> (i32, i32) {
    %c0_i32 = arith.constant 0 : i32
    %c0_i32_0 = arith.constant 0 : i32
    %c0_i32_1 = arith.constant 0 : i32
    return %c0_i32, %c0_i32_0 : i32, i32
  }
  func.func @transform_6(%arg0: i32) -> (i32, i32) {
    %c0_i32 = arith.constant 0 : i32
    %c0_i32_0 = arith.constant 0 : i32
    %c0_i32_1 = arith.constant 0 : i32
    return %c0_i32, %c0_i32_0 : i32, i32
  }
  func.func @transform_7(%arg0: i32) -> (i32, i32) {
    %c0_i32 = arith.constant 0 : i32
    %c0_i32_0 = arith.constant 0 : i32
    return %arg0, %c0_i32 : i32, i32
  }
}

</mosaic_0001>

<bundles_post_ra>
// kernel: dqn_forward.1
= control target key start
LH: loop header
LB: loop body
LE: loop exit
PB: predicated region body
PF: predicated region fallthrough
CT: control target
= control target key end

     0   :  { %v443_v3 = vmov 0.0|0.0   ;;  %vm444_vm0 = vmmov 0   ;;  %v445_v6 = vmov 0.0   ;;  %s574_s0 = inlined_call_operand.vmem [shape: f32[2,32], index: 0, kind: input, shape index: {}]   ;;  %s575_s1 = inlined_call_operand.vmem [shape: f32[32,64], index: 1, kind: input, shape index: {}]   ;;  %s576_s2 = inlined_call_operand.vmem [shape: f32[1,64], index: 2, kind: input, shape index: {}]   ;;  %s577_s3 = inlined_call_operand.vmem [shape: f32[64,64], index: 3, kind: input, shape index: {}]   ;;  %s578_s4 = inlined_call_operand.vmem [shape: f32[1,64], index: 4, kind: input, shape index: {}]   ;;  %s579_s5 = inlined_call_operand.vmem [shape: f32[64,128], index: 5, kind: input, shape index: {}]   ;;  %s580_s6 = inlined_call_operand.vmem [shape: f32[1,128], index: 6, kind: input, shape index: {}]   ;;  %s581_s7 = inlined_call_operand.hbm [shape: f32[2,128], index: 7, kind: output, shape index: {}]  }
   0x1   :  { %v28_v0 = vld [vmem:[%s575_s1] sm:$0xff]  ;;  %v29_v1 = vld [vmem:[%s575_s1 + $0x8] sm:$0xff]  ;;  %v30_v2 = vld [vmem:[%s575_s1 + $0x10] sm:$0xff]  ;;  %385 = vmatprep.subr.bf16.mxu0 %v443_v3  ;;  %344 = vmatprep.mubr.msk.f32.mxu0 %vm444_vm0, %v445_v6 }
   0x2   :  { %v386_v4 = vpack.c.bf16 %v29_v1, %v28_v0  ;;  %v31_v5 = vld [vmem:[%s575_s1 + $0x18] sm:$0xff]  ;;  %v114_v7 = vld [vmem:[%s577_s3] sm:$0xff]  ;;  %391 = vmatprep.subr.bf16.mxu1 %v443_v3  ;;  %v115_v8 = vld [vmem:[%s577_s3 + $0x8] sm:$0xff]  ;;  %363 = vmatprep.mubr.msk.f32.mxu1 %vm444_vm0, %v445_v6 }
   0x3   :  { %v116_v9 = vld [vmem:[%s577_s3 + $0x10] sm:$0xff]  ;;  %v117_v10 = vld [vmem:[%s577_s3 + $0x18] sm:$0xff]  ;;  %v389_v11 = vpack.c.bf16 %v31_v5, %v30_v2  ;;  %v392_v12 = vpack.c.bf16 %v115_v8, %v114_v7 }
   0x4   :  { %387 = vmatpush3.bf16.msra.mxu0 %v386_v4 }
   0x5   :  { %388 = vmatprep.subr.bf16.mxu0 %v443_v3 }
   0x6   :  { %12 = vsyncpa [#allocation3], 0  ;;  %393 = vmatpush3.bf16.msra.mxu1 %v392_v12  ;;  %v395_v13 = vpack.c.bf16 %v117_v10, %v116_v9  ;;  %v118_v14 = vld [vmem:[%s577_s3 + $0x20] sm:$0xff]  ;;  %v119_v15 = vld [vmem:[%s577_s3 + $0x28] sm:$0xff]  ;;  %vm39_vm1 = vcmask 261120   ;;  %vm129_vm2 = vcmask 523264  }
   0x7   :  { %394 = vmatprep.subr.bf16.mxu1 %v443_v3  ;;  %v27_v16 = vld [vmem:[%s574_s0] sm:$0x3]  ;;  %v398_v17 = vpack.c.bf16 %v119_v15, %v118_v14  ;;  %v120_v18 = vld [vmem:[%s577_s3 + $0x30] sm:$0xff]  ;;  %v121_v19 = vld [vmem:[%s577_s3 + $0x38] sm:$0xff]  ;;  %s446_s21 = smov [#allocation2]  }
   0x8   :  { %390 = vmatpush3.bf16.msra.mxu0 %v389_v11  ;;  %v401_v20 = vpack.c.bf16 %v121_v19, %v120_v18  ;;  %v204_v21 = vld [vmem:[%s579_s5] sm:$0xff]  ;;  %v205_v22 = vld [vmem:[%s579_s5 + $0x8] sm:$0xff]  ;;  %v206_v23 = vld [vmem:[%s579_s5 + $0x10] sm:$0xff]  ;;  %s299_s22 = sshll.u32 %s446_s21, 4  ;;  %s300_s22 = int_to_ptr.vmem [resolvable:$true] %s299_s22 }
   0x9   :  { %403 = vmatprep.subr.bf16.mxu0 %v443_v3  ;;  %v404_v24 = vpack.c.bf16 %v205_v22, %v204_v21  ;;  %v207_v25 = vld [vmem:[%s579_s5 + $0x18] sm:$0xff]  ;;  %v208_v27 = vld [vmem:[%s579_s5 + $0x20] sm:$0xff]  ;;  %v209_v28 = vld [vmem:[%s579_s5 + $0x28] sm:$0xff]  ;;  %p424_p1 = scmp.lt.s32.totalorder %s300_s22, %s300_s22 }
   0xa   :  { %396 = vmatpush3.bf16.msra.mxu1 %v395_v13  ;;  %v407_v26 = vpack.c.bf16 %v207_v25, %v206_v23  ;;  %v410_v29 = vpack.c.bf16 %v209_v28, %v208_v27  ;;  %v307_v30 = vld [vmem:[%s576_s2] ss:$0 sm:$0xff]  ;;  %v210_v35 = vld [vmem:[%s579_s5 + $0x30] sm:$0xff]  ;;  %v211_v36 = vld [vmem:[%s579_s5 + $0x38] sm:$0xff]  ;;  %s419_s5 = scalar_lea.vmem %s300_s22, 32 }
   0xb   :  { %345 = vmatmul.mubr.msk.f32.vlgmr.msra.gmra.mrb[0].mxu0 %vm39_vm1, %v27_v16  ;;  %397 = vmatprep.subr.bf16.mxu1 %v443_v3  ;;  %v413_v37 = vpack.c.bf16 %v211_v36, %v210_v35  ;;  %v309_v38 = vld [vmem:[%s578_s4] ss:$0 sm:$0xff]  ;;  %p420_p0 = scmp.ne.s32.totalorder %s300_s22, %s419_s5  ;;  %p425_p2 = scmp.lt.s32.totalorder %s419_s5, %s419_s5 }
   0xc   :  { %382 = vmatprep.mubr.msk.f32.mxu0 %vm444_vm0, %v445_v6  ;;  %405 = vmatpush3.bf16.msra.mxu0 %v404_v24  ;;  %v311_v43 = vld [vmem:[%s580_s6] ss:$0 sm:$0xff] }
   0xd   :  { %406 = vmatprep.subr.bf16.mxu0 %v443_v3  ;;  %p426_p3 = por %p425_p2, %p424_p1 }
   0xe   :  { %399 = vmatpush3.bf16.msra.mxu1 %v398_v17 }
   0xf   :  { %400 = vmatprep.subr.bf16.mxu1 %v443_v3  ;;  %p427_p4 = pnand %p426_p3, %p420_p0 }
  0x10   :  { %408 = vmatpush3.bf16.msra.mxu0 %v407_v26 }
  0x11   :  { %409 = vmatprep.subr.bf16.mxu0 %v443_v3 }
  0x12   :  { %402 = vmatpush3.bf16.msra.mxu1 %v401_v20 }
  0x14   :  { %411 = vmatpush3.bf16.msra.mxu0 %v410_v29 }
  0x15   :  { %412 = vmatprep.subr.bf16.mxu0 %v443_v3 }
  0x18   :  { %414 = vmatpush3.bf16.msra.mxu0 %v413_v37 }
  0xde   :  { %v109_v31 = vpop.f32.mrb[0].mxu0 }
  0xdf   :  { %v110_v32 = vadd.f32 %v307_v30, %v109_v31  ;;  %v346_v33 = vpop.f32.mrb[1].mxu0 }
  0xe1   :  { %v113_v34 = vmax.f32 %v110_v32, 0.0 }
  0xe3   :  { %364 = vmatmul.mubr.msk.f32.vlgmr.msra.gmra.mrb[0].mxu1 %vm129_vm2, %v113_v34 }
 0x1b6   :  { %v199_v39 = vpop.f32.mrb[0].mxu1 }
 0x1b7   :  { %v200_v40 = vadd.f32 %v309_v38, %v199_v39  ;;  %v365_v41 = vpop.f32.mrb[1].mxu1 }
 0x1b9   :  { %v203_v42 = vmax.f32 %v200_v40, 0.0 }
 0x1bb   :  { %383 = vmatmul.mubr.msk.f32.vlgmr.msra.gmra.mrb[2].mxu0 %vm129_vm2, %v203_v42 }
 0x28e   :  { %v288_v44 = vpop.f32.mrb[2].mxu0 }
 0x28f   :  { %v289_v45 = vadd.f32 %v311_v43, %v288_v44  ;;  %v384_v46 = vpop.f32.mrb[3].mxu0 }
 0x291   :  { %292 = vst [vmem:[#allocation2] sm:$0x3] %v289_v45 }
 0x292   :  { %430 = shalt.err (!%p427_p4)
}
 0x293   :  { %s431_s24 = scalar_lea.hbm %s581_s7, 32 }
 0x294   :  { %p432_p5 = scmp.ne.s32.totalorder %s581_s7, %s431_s24  ;;  %p435_p6 = scmp.lt.u32.totalorder %s431_s24, %s581_s7 }
 0x296   :  { %p437_p7 = pnand %p435_p6, %p432_p5 }
 0x298   :  { %440 = shalt.err (!%p437_p7)
}
 0x299   :  { %302 = dma.vmem_to_hbm [thread:$0]  %s300_s22, 32, %s581_s7, [#allocation3]  }
 0x29a   :  { %441 = dma.done.wait [#allocation3], 32  }
 0x29b   :  { %442 = vsyncadd [#allocation3], 4294967264 }
 0x29c   :  { %306 = vsyncpa [#allocation3], 1 }

</bundles_post_ra>
